<compile_context>
chip_gen: v5e
topology: v5e:2x2
jax: 0.10.0
libtpu: 0.0.40
codegen_flags: <defaults>
</compile_context>

<pallas_src>
import functools
import math

import jax
import jax.numpy as jnp
import numpy as np
from jax import lax
from jax.experimental import pallas as pl
from jax.experimental.pallas import tpu as pltpu


# ----------------------------- fused Pallas kernel -----------------------------

def _self_attn_kernel(x_ref, w_ref, sel_ref, o_ref, *, L, H, hd):
    D = H * hd      # model dim (32)
    HL = H * L      # block-expanded K/V rows (64) -> lane-dense score width

    x = x_ref[...]                                   # (L, D)

    # Packed parameters (single DMA):
    #   rows 0..D-1 : [ Wq^T * scale | Wk^T | Wv^T | Wproj^T ]   -> (D, 4D)
    #   row  D      : [      0       |  0   |  0   | b_proj  ]
    w_qkv = w_ref[0:D, 0:3 * D]                      # (D, 3D)
    w_p = w_ref[0:D, 3 * D:4 * D]                    # (D, D)
    b_p = w_ref[D:D + 1, 3 * D:4 * D]                # (1, D)

    # Fused Q/K/V projection (qkv_bias=False). Softmax scale is pre-folded into Wq.
    qkv = jnp.dot(x, w_qkv, preferred_element_type=jnp.float32)      # (L, 3D)
    q = qkv[:, 0:D]
    k = qkv[:, D:2 * D]
    v = qkv[:, 2 * D:3 * D]

    # Precomputed head-block selector (constant kernel input, hoisted to host):
    # sel[h*L + j, c] = 1 iff feature column c belongs to head h (c // hd == h).
    sel = sel_ref[...]                               # (HL, D)

    # Block-expanded K / V: head h occupies rows [h*L, (h+1)*L) keeping only its
    # own hd feature columns. One lane-dense score matmul then covers every head
    # and the PV product lands directly in (L, D) output layout.
    k_exp = sel * jnp.concatenate([k] * H, axis=0)   # (HL, D)
    v_exp = sel * jnp.concatenate([v] * H, axis=0)   # (HL, D)

    # Scores: contract the feature dims directly (no explicit K transpose).
    # s[l, h*L + l'] = scale * <q_h(l), k_h(l')>
    s = lax.dot_general(q, k_exp, (((1,), (1,)), ((), ())),
                        preferred_element_type=jnp.float32)          # (L, HL)

    # Per-head-segment stable softmax numerators. Using a per-segment max (not a
    # shared row max) removes the cross-head underflow edge case. H is tiny and
    # static, so unrolled lane slices are cheaper/safer than a (L,H,L) reshape.
    e_parts = []
    for h in range(H):
        s_h = s[:, h * L:(h + 1) * L]                                # (L, L)
        m_h = jnp.max(s_h, axis=-1, keepdims=True)                   # (L, 1)
        e_parts.append(jnp.exp(s_h - m_h))
    e = jnp.concatenate(e_parts, axis=1)                             # (L, HL)

    # Fused PV + denominator matmul: rhs = [V_exp | sel]. denom[l, c] is the
    # exp-sum of the head segment that owns feature column c.
    rhs = jnp.concatenate([v_exp, sel], axis=1)                      # (HL, 2D)
    od = jnp.dot(e, rhs, preferred_element_type=jnp.float32)         # (L, 2D)
    attn = od[:, 0:D] / od[:, D:2 * D]                               # exact normalize

    # Output projection (with bias) -> one (L, D) store.
    out = jnp.dot(attn, w_p, preferred_element_type=jnp.float32) + b_p
    o_ref[...] = out.astype(o_ref.dtype)


def fused_self_attention(x, w_pack, sel, *, H, hd):
    B, L, D = x.shape
    kernel = functools.partial(_self_attn_kernel, L=L, H=H, hd=hd)
    return pl.pallas_call(
        kernel,
        out_shape=jax.ShapeDtypeStruct((B, L, D), x.dtype),
        grid=(B,),
        in_specs=[
            pl.BlockSpec((None, L, D), lambda b: (b, 0, 0)),      # x, one batch per step
            pl.BlockSpec((D + 1, 4 * D), lambda b: (0, 0)),       # packed weights + bias
            pl.BlockSpec((H * L, D), lambda b: (0, 0)),           # head-block selector
        ],
        out_specs=pl.BlockSpec((None, L, D), lambda b: (b, 0, 0)),
        compiler_params=pltpu.CompilerParams(dimension_semantics=("parallel",)),
    )(x, w_pack, sel)


# ----------------------------- Module wrapper -----------------------------

class SelfAttentionPallas:
    """Matches SelfAttention(dim, num_heads, qkv_bias=False, qk_norm=None,
    pre_only=False) forward semantics."""

    def __init__(self, dim, num_heads, key):
        self.dim = dim
        self.num_heads = num_heads
        self.head_dim = dim // num_heads
        D, H, hd = dim, num_heads, self.head_dim

        k1, k2, k3 = jax.random.split(key, 3)
        bound = 1.0 / math.sqrt(dim)
        # nn.Linear layout: weight is (out_features, in_features).
        w_qkv = jax.random.uniform(k1, (3 * D, D), jnp.float32, minval=-bound, maxval=bound)
        w_proj = jax.random.uniform(k2, (D, D), jnp.float32, minval=-bound, maxval=bound)
        b_proj = jax.random.uniform(k3, (D,), jnp.float32, minval=-bound, maxval=bound)

        # Pack [Wq^T*scale | Wk^T | Wv^T | Wproj^T] + bias row into one lane-dense
        # (D+1, 4D) slab -> single weight DMA, softmax scale folded into Wq.
        scale = 1.0 / math.sqrt(hd)
        w_qkv_np = np.asarray(w_qkv)
        w_proj_np = np.asarray(w_proj)
        b_proj_np = np.asarray(b_proj)
        w_pack = np.zeros((D + 1, 4 * D), np.float32)
        w_pack[:D, 0:D] = w_qkv_np[0:D].T * scale
        w_pack[:D, D:2 * D] = w_qkv_np[D:2 * D].T
        w_pack[:D, 2 * D:3 * D] = w_qkv_np[2 * D:3 * D].T
        w_pack[:D, 3 * D:4 * D] = w_proj_np.T
        w_pack[D, 3 * D:4 * D] = b_proj_np
        self.w_pack = jnp.asarray(w_pack)

        # Unmodified copies for the pure-JAX reference check.
        self.ref_w_qkv_t = jnp.asarray(w_qkv_np.T)          # (D, 3D)
        self.ref_w_proj_t = jnp.asarray(w_proj_np.T)        # (D, D)
        self.ref_b_proj = jnp.asarray(b_proj_np)            # (D,)

        self._sel_cache = {}                                 # keyed by seq length L

    def _sel(self, L):
        # Constant head-block selector, precomputed on host (hoisted out of kernel).
        if L not in self._sel_cache:
            H, hd, D = self.num_heads, self.head_dim, self.dim
            row_head = np.arange(H * L)[:, None] // L        # (HL, 1)
            col_head = np.arange(D)[None, :] // hd           # (1, D)
            self._sel_cache[L] = jnp.asarray(
                (row_head == col_head).astype(np.float32))   # (HL, D)
        return self._sel_cache[L]

    def __call__(self, x):
        B, L, D = x.shape
        return fused_self_attention(x, self.w_pack, self._sel(L),
                                    H=self.num_heads, hd=self.head_dim)


# Pure-JAX reference (same math, no Pallas) for correctness checking.
def reference_forward(mod: SelfAttentionPallas, x):
    B, L, D = x.shape
    H, hd = mod.num_heads, mod.head_dim
    qkv = x.reshape(B * L, D) @ mod.ref_w_qkv_t              # (B*L, 3D), no bias
    qkv = qkv.reshape(B, L, 3, H, hd)
    q, k, v = qkv[:, :, 0], qkv[:, :, 1], qkv[:, :, 2]
    q = q.transpose(0, 2, 1, 3)
    k = k.transpose(0, 2, 1, 3)
    v = v.transpose(0, 2, 1, 3)
    s = jnp.einsum("bhqd,bhkd->bhqk", q, k) / math.sqrt(hd)
    p = jax.nn.softmax(s, axis=-1)
    o = jnp.einsum("bhqk,bhkd->bhqd", p, v)
    o = o.transpose(0, 2, 1, 3).reshape(B * L, D)
    return (o @ mod.ref_w_proj_t + mod.ref_b_proj).reshape(B, L, D)


if __name__ == "__main__":
    key = jax.random.PRNGKey(0)
    kx, kw = jax.random.split(key)

    B, L, dim, heads = 2, 16, 32, 4
    x = jax.random.normal(kx, (B, L, dim), jnp.float32)

    mod = SelfAttentionPallas(dim, heads, kw)
    fwd = jax.jit(mod.__call__)
    out = jax.block_until_ready(fwd(x))

    ref = reference_forward(mod, x)
    assert out.shape == (B, L, dim)
    # Exact normalization + per-segment max -> f32-tight agreement.
    assert jnp.allclose(out, ref, atol=1e-4, rtol=1e-4), "mismatch vs reference"

    print("KERNEL_OK")
</pallas_src>

<mosaic_0001>
module attributes {stable_mosaic.version = 11 : i64} {
  func.func @_self_attn_kernel(%arg0: i32, %arg1: memref<1x16x32xf32, #tpu.memory_space<vmem>>, %arg2: memref<33x128xf32, #tpu.memory_space<vmem>>, %arg3: memref<64x32xf32, #tpu.memory_space<vmem>>, %arg4: memref<1x16x32xf32, #tpu.memory_space<vmem>>) attributes {dimension_semantics = [#tpu.dimension_semantics<parallel>], iteration_bounds = array<i64: 2>, scalar_prefetch = 0 : i64, scratch_operands = 0 : i64, tpu.core_type = #tpu.core_type<tc>, window_params = [{transform_indices = @transform_0, window_bounds = array<i64: 1, 16, 32>}, {pipeline_mode = #tpu.pipeline_mode<synchronous>, transform_indices = @transform_1, window_bounds = array<i64: 33, 128>}, {pipeline_mode = #tpu.pipeline_mode<synchronous>, transform_indices = @transform_2, window_bounds = array<i64: 64, 32>}, {transform_indices = @transform_3, window_bounds = array<i64: 1, 16, 32>}]} {
    %c0 = arith.constant 0 : index
    %c0_0 = arith.constant 0 : index
    %c0_1 = arith.constant 0 : index
    %0 = vector.load %arg1[%c0, %c0_0, %c0_1] : memref<1x16x32xf32, #tpu.memory_space<vmem>>, vector<1x16x32xf32>
    %1 = vector.shape_cast %0 : vector<1x16x32xf32> to vector<16x32xf32>
    %c0_2 = arith.constant 0 : index
    %c0_3 = arith.constant 0 : index
    %2 = vector.load %arg2[%c0_2, %c0_3] : memref<33x128xf32, #tpu.memory_space<vmem>>, vector<32x96xf32>
    %c0_4 = arith.constant 0 : index
    %c96 = arith.constant 96 : index
    %3 = vector.load %arg2[%c0_4, %c96] : memref<33x128xf32, #tpu.memory_space<vmem>>, vector<32x32xf32>
    %c32 = arith.constant 32 : index
    %c96_5 = arith.constant 96 : index
    %4 = vector.load %arg2[%c32, %c96_5] : memref<33x128xf32, #tpu.memory_space<vmem>>, vector<1x32xf32>
    %cst = arith.constant dense<0.000000e+00> : vector<16x96xf32>
    %5 = tpu.matmul %1, %2, %cst {dimension_numbers = #tpu.dot_dimension_numbers<[1], [0], [0], [1], [0, 0, 1, 1], [], []>} : vector<16x32xf32>, vector<32x96xf32>, vector<16x96xf32> -> vector<16x96xf32>
    %6 = vector.extract_strided_slice %5 {offsets = [0, 0], sizes = [16, 32], strides = [1, 1]} : vector<16x96xf32> to vector<16x32xf32>
    %7 = vector.extract_strided_slice %5 {offsets = [0, 32], sizes = [16, 32], strides = [1, 1]} : vector<16x96xf32> to vector<16x32xf32>
    %8 = vector.extract_strided_slice %5 {offsets = [0, 64], sizes = [16, 32], strides = [1, 1]} : vector<16x96xf32> to vector<16x32xf32>
    %c0_6 = arith.constant 0 : index
    %c0_7 = arith.constant 0 : index
    %9 = vector.load %arg3[%c0_6, %c0_7] : memref<64x32xf32, #tpu.memory_space<vmem>>, vector<64x32xf32>
    %10 = tpu.concatenate %7, %7, %7, %7 in 0 : vector<16x32xf32>, vector<16x32xf32>, vector<16x32xf32>, vector<16x32xf32> -> vector<64x32xf32>
    %11 = arith.mulf %9, %10 : vector<64x32xf32>
    %12 = tpu.concatenate %8, %8, %8, %8 in 0 : vector<16x32xf32>, vector<16x32xf32>, vector<16x32xf32>, vector<16x32xf32> -> vector<64x32xf32>
    %13 = arith.mulf %9, %12 : vector<64x32xf32>
    %cst_8 = arith.constant dense<0.000000e+00> : vector<16x64xf32>
    %14 = tpu.matmul %6, %11, %cst_8 {dimension_numbers = #tpu.dot_dimension_numbers<[1], [1], [0], [0], [0, 0, 1, 0], [], []>} : vector<16x32xf32>, vector<64x32xf32>, vector<16x64xf32> -> vector<16x64xf32>
    %15 = vector.extract_strided_slice %14 {offsets = [0, 0], sizes = [16, 16], strides = [1, 1]} : vector<16x64xf32> to vector<16x16xf32>
    %cst_9 = arith.constant dense<0xFF800000> : vector<16xf32>
    %16 = vector.multi_reduction <maximumf>, %15, %cst_9 [1] : vector<16x16xf32> to vector<16xf32>
    %17 = vector.shape_cast %16 : vector<16xf32> to vector<16x1xf32>
    %18 = vector.broadcast %17 : vector<16x1xf32> to vector<16x16xf32>
    %19 = arith.subf %15, %18 : vector<16x16xf32>
    %20 = math.exp %19 : vector<16x16xf32>
    %21 = vector.extract_strided_slice %14 {offsets = [0, 16], sizes = [16, 16], strides = [1, 1]} : vector<16x64xf32> to vector<16x16xf32>
    %cst_10 = arith.constant dense<0xFF800000> : vector<16xf32>
    %22 = vector.multi_reduction <maximumf>, %21, %cst_10 [1] : vector<16x16xf32> to vector<16xf32>
    %23 = vector.shape_cast %22 : vector<16xf32> to vector<16x1xf32>
    %24 = vector.broadcast %23 : vector<16x1xf32> to vector<16x16xf32>
    %25 = arith.subf %21, %24 : vector<16x16xf32>
    %26 = math.exp %25 : vector<16x16xf32>
    %27 = vector.extract_strided_slice %14 {offsets = [0, 32], sizes = [16, 16], strides = [1, 1]} : vector<16x64xf32> to vector<16x16xf32>
    %cst_11 = arith.constant dense<0xFF800000> : vector<16xf32>
    %28 = vector.multi_reduction <maximumf>, %27, %cst_11 [1] : vector<16x16xf32> to vector<16xf32>
    %29 = vector.shape_cast %28 : vector<16xf32> to vector<16x1xf32>
    %30 = vector.broadcast %29 : vector<16x1xf32> to vector<16x16xf32>
    %31 = arith.subf %27, %30 : vector<16x16xf32>
    %32 = math.exp %31 : vector<16x16xf32>
    %33 = vector.extract_strided_slice %14 {offsets = [0, 48], sizes = [16, 16], strides = [1, 1]} : vector<16x64xf32> to vector<16x16xf32>
    %cst_12 = arith.constant dense<0xFF800000> : vector<16xf32>
    %34 = vector.multi_reduction <maximumf>, %33, %cst_12 [1] : vector<16x16xf32> to vector<16xf32>
    %35 = vector.shape_cast %34 : vector<16xf32> to vector<16x1xf32>
    %36 = vector.broadcast %35 : vector<16x1xf32> to vector<16x16xf32>
    %37 = arith.subf %33, %36 : vector<16x16xf32>
    %38 = math.exp %37 : vector<16x16xf32>
    %39 = tpu.concatenate %20, %26, %32, %38 in 1 : vector<16x16xf32>, vector<16x16xf32>, vector<16x16xf32>, vector<16x16xf32> -> vector<16x64xf32>
    %40 = tpu.concatenate %13, %9 in 1 : vector<64x32xf32>, vector<64x32xf32> -> vector<64x64xf32>
    %cst_13 = arith.constant dense<0.000000e+00> : vector<16x64xf32>
    %41 = tpu.matmul %39, %40, %cst_13 {dimension_numbers = #tpu.dot_dimension_numbers<[1], [0], [0], [1], [0, 0, 1, 1], [], []>} : vector<16x64xf32>, vector<64x64xf32>, vector<16x64xf32> -> vector<16x64xf32>
    %42 = vector.extract_strided_slice %41 {offsets = [0, 0], sizes = [16, 32], strides = [1, 1]} : vector<16x64xf32> to vector<16x32xf32>
    %43 = vector.extract_strided_slice %41 {offsets = [0, 32], sizes = [16, 32], strides = [1, 1]} : vector<16x64xf32> to vector<16x32xf32>
    %44 = arith.divf %42, %43 : vector<16x32xf32>
    %cst_14 = arith.constant dense<0.000000e+00> : vector<16x32xf32>
    %45 = tpu.matmul %44, %3, %cst_14 {dimension_numbers = #tpu.dot_dimension_numbers<[1], [0], [0], [1], [0, 0, 1, 1], [], []>} : vector<16x32xf32>, vector<32x32xf32>, vector<16x32xf32> -> vector<16x32xf32>
    %46 = vector.broadcast %4 : vector<1x32xf32> to vector<16x32xf32>
    %47 = arith.addf %45, %46 : vector<16x32xf32>
    %c0_15 = arith.constant 0 : index
    %c0_16 = arith.constant 0 : index
    %c0_17 = arith.constant 0 : index
    %48 = vector.load %arg4[%c0_15, %c0_16, %c0_17] : memref<1x16x32xf32, #tpu.memory_space<vmem>>, vector<1x16x32xf32>
    %49 = vector.shape_cast %48 : vector<1x16x32xf32> to vector<16x32xf32>
    %50 = vector.shape_cast %47 : vector<16x32xf32> to vector<1x16x32xf32>
    tpu.vector_store %arg4[%c0_15, %c0_16, %c0_17], %50 {strides = array<i32>} : memref<1x16x32xf32, #tpu.memory_space<vmem>>, vector<1x16x32xf32>,
    return
  }
  func.func @transform_0(%arg0: i32) -> (i32, i32, i32) {
    %c0_i32 = arith.constant 0 : i32
    %c0_i32_0 = arith.constant 0 : i32
    %c0_i32_1 = arith.constant 0 : i32
    return %arg0, %c0_i32, %c0_i32_0 : i32, i32, i32
  }
  func.func @transform_1(%arg0: i32) -> (i32, i32) {
    %c0_i32 = arith.constant 0 : i32
    %c0_i32_0 = arith.constant 0 : i32
    %c0_i32_1 = arith.constant 0 : i32
    return %c0_i32, %c0_i32_0 : i32, i32
  }
  func.func @transform_2(%arg0: i32) -> (i32, i32) {
    %c0_i32 = arith.constant 0 : i32
    %c0_i32_0 = arith.constant 0 : i32
    %c0_i32_1 = arith.constant 0 : i32
    return %c0_i32, %c0_i32_0 : i32, i32
  }
  func.func @transform_3(%arg0: i32) -> (i32, i32, i32) {
    %c0_i32 = arith.constant 0 : i32
    %c0_i32_0 = arith.constant 0 : i32
    %c0_i32_1 = arith.constant 0 : i32
    return %arg0, %c0_i32, %c0_i32_0 : i32, i32, i32
  }
}

</mosaic_0001>

<bundles_post_ra>
// kernel: a_call__.1
= control target key start
LH: loop header
LB: loop body
LE: loop exit
PB: predicated region body
PF: predicated region fallthrough
CT: control target
= control target key end

     0   :  { %8 = vsyncpa [#allocation3], 0  ;;  %s1289_s0 = inlined_call_operand.hbm [shape: f32[2,16,32], index: 0, kind: input, shape index: {}]   ;;  %s1290_s1 = inlined_call_operand.hbm [shape: f32[33,128], index: 1, kind: input, shape index: {}]   ;;  %s1291_s2 = inlined_call_operand.hbm [shape: f32[64,32], index: 2, kind: input, shape index: {}]   ;;  %s1292_s3 = inlined_call_operand.hbm [shape: f32[2,16,32], index: 3, kind: output, shape index: {}]  }
   0x1   :  { %10 = vsyncpa [#allocation3 + $0x1], 0 }
   0x2   :  { %11 = vsyncpa [#allocation6], 0 }
   0x3   :  { %12 = vsyncpa [#allocation4], 0 }
   0x4   :  { %14 = vsyncpa [#allocation4 + $0x1], 0  ;;  %s1029_s12 = smov 0   ;;  %s1031_s13 = smov 0  }
   0x5   :  { %s1033_s14 = smov 0   ;;  %s1035_s15 = smov 0  }
   0x6 LB: > { %s1050_s16 = sadd.s32 4294967295, %s998_s15   ;;  %s677_s17 = sadd.s32 4294967294, %s998_s15   ;;  %s998_s15 = sphi %s1035_s15, %s1302_s15   ;;  %s994_s14 = sphi %s1033_s14, %s1301_s14   ;;  %s990_s13 = sphi %s1031_s13, %s1300_s13   ;;  %s986_s12 = sphi %s1029_s12, %s1299_s12  }
   0x7   : > { %p40_p0 = scmp.ne.s32.totalorder %s990_s13, %s986_s12  ;;  %p41_p1 = scmp.eq.s32.totalorder %s1050_s16, 0 }
   0x8   : > { %p106_p2 = scmp.eq.s32.totalorder %s1050_s16, 1  ;;  %p112_p3 = scmp.eq.s32.totalorder %s677_s17, 1 }
   0x9   : > { %p1059_p4 = por %p41_p1, %p40_p0  ;;  %p678_p5 = scmp.ge.s32.totalorder %s998_s15, 1 }
   0xa   : > { %p1064_p6 = por %p112_p3, %p40_p0  ;;  %p119_p7 = scmp.lt.s32.totalorder %s998_s15, 3 }
   0xb   : > { %s130_s22 = sshll.u32 %s1290_s1, 4  ;;  %s1000_s24 = smov [#allocation5]   ;;  %s131_s22 = int_to_ptr.hbm [resolvable:$true] %s130_s22 }
   0xc   : > { %p1072_p8 = pnand %p678_p5, %p119_p7  ;;  %s132_s25 = sshll.u32 %s1000_s24, 4  ;;  %s133_s25 = int_to_ptr.vmem [resolvable:$true] %s132_s25 }
   0xd   : > { %s144_s28 = sshll.u32 %s1291_s2, 4  ;;  %s1001_s29 = smov 128   ;;  %s145_s28 = int_to_ptr.hbm [resolvable:$true] %s144_s28 }
   0xe   : > { %p725_p9 = pneg %p1072_p8  ;;  %s1002_s30 = smov 8  }
   0xf   : > { %s1003_s4 = smov [#allocation7]   ;;  %s1091_s6 = sadd.s32 1, %s998_s15  }
  0x10   : > { %p726_p10 = pnand %p725_p9, %p41_p1  ;;  %s146_s5 = sshll.u32 %s1003_s4, 4  ;;  %s147_s5 = int_to_ptr.vmem [resolvable:$true] %s146_s5 }
  0x11   : > { %s27_s7 = sadd.s32 1, %s994_s14  ;;  %s24_s8 = ssub.s32 %s998_s15, %s1091_s6 }
  0x12   : > { %728 = dma.hbm_to_vmem [thread:$0]  (!%p726_p10), %s131_s22, 640, %s133_s25, [#allocation6], %s1001_s29, %s1001_s29, %s1002_s30  }
  0x13   : > { %731 = dma.hbm_to_vmem [thread:$0]  (!%p726_p10), %s145_s28, 1024, %s147_s5, [#allocation6], %s1001_s29, %s1001_s29, %s1002_s30  }
  0x14   : > { %p34_p12 = scmp.ne.s32.totalorder %s994_s14, %s990_s13  ;;  %p25_p13 = scmp.eq.s32.totalorder %s24_s8, 0 }
  0x15   : > { %p35_p0 = scmp.eq.s32.totalorder %s998_s15, 0  ;;  %p742_p5 = scmp.lt.s32.totalorder %s998_s15, 2 }
  0x16   : > { %p1101_p3 = por %p106_p2, %p34_p12  ;;  %s160_s11 = sand.u32 1, %s994_s14  }
  0x17   : > { %s1107_s10 = scalar_select %p25_p13, %s994_s14, %s27_s7  }
  0x18   : > { %p36_p7 = por %p35_p0, %p34_p12  ;;  %s682_s17 = sshll.u32 %s160_s11, 4 }
  0x19   : > { %s711_s20 = sshll.u32 %s998_s15, 4  ;;  %s164_s25 = scalar_lea.vmem [#allocation2], %s682_s17 }
  0x1a   : > { %s169_s24 = scalar_lea.hbm %s1289_s0, %s711_s20  ;;  %s172_s26 = sshll.u32 %s164_s25, 4  ;;  %s173_s26 = int_to_ptr.vmem [resolvable:$true] %s172_s26 }
  0x1b   : > { %s170_s27 = sshll.u32 %s169_s24, 4  ;;  %p1114_p2 = pnand %p742_p5, %p36_p7  ;;  %s171_s27 = int_to_ptr.hbm [resolvable:$true] %s170_s27 }
  0x1c   : > { %s161_s4 = scalar_lea.sflag [#allocation3], %s160_s11  ;;  %s898_s5 = sshra.s32 %s171_s27, 4  ;;  %s899_s5 = int_to_ptr.hbm [resolvable:$true] %s898_s5 }
  0x1d   : > { %s900_s7 = scalar_lea.hbm %s899_s5, 16  ;;  %p902_p10 = pneg %p1114_p2 }
  0x1e   : > { %p901_p9 = scmp.ne.s32.totalorder %s899_s5, %s900_s7  ;;  %s905_s20 = scalar_lea.hbm %s1289_s0, 32 }
  0x1f   : > { %p906_p0 = scmp.lt.s32.totalorder %s899_s5, %s1289_s0  ;;  %p907_p5 = scmp.lt.s32.totalorder %s905_s20, %s900_s7 }
  0x20   : > { %p903_p12 = pnand %p902_p10, %p901_p9 }
  0x21   : > { %p908_p7 = por %p907_p5, %p906_p0 }
  0x22   : > { %p904_p13 = pneg %p903_p12 }
  0x24   : > { %p909_p11 = pnand %p908_p7, %p904_p13 }
  0x26   : > { %912 = shalt.err (!%p909_p11)
}
  0x27   : > { %735 = dma.hbm_to_vmem [thread:$0]  (!%p1114_p2), %s171_s27, 256, %s173_s26, %s161_s4, %s1001_s29, %s1001_s29, %s1002_s30  }
  0x28   : > { %184 = sbr.rel (%p1072_p8) target bundleno = 1041 (0x411), region = 32  ;;  %s1134_s11 = sand.u32 (!%p1072_p8), 1, %s990_s13  }
  0x29   : > { %s686_s24 = sshll.u32 (!%p1072_p8), %s1134_s11, 4  ;;  %s187_s25 = scalar_lea.sflag (!%p1072_p8), [#allocation3], %s1134_s11 }
  0x2a   : > { %s190_s5 = scalar_lea.vmem (!%p1072_p8), [#allocation2], %s686_s24 }
  0x2d   : > { %973 = dma.done.wait (%p1059_p4), %s187_s25, 256  }
  0x2e   : > { %975 = vsyncadd (%p1059_p4), %s187_s25, 4294967040 }
  0x2f   : > { %977 = dma.done.wait (%p41_p1), [#allocation6], 1664  }
  0x30   : > { %979 = vsyncadd (%p41_p1), [#allocation6], 4294965632  ;;  %v1148_v0 = vld [vmem:[#allocation5 + $0x18] sm:$0xff]  ;;  %v1150_v1 = vld [vmem:[#allocation5 + $0x10] sm:$0xff]  ;;  %vm231_vm0 = vcmask 261120   ;;  %s1004_s18 = smov 32  }
  0x31   : > { %250 = vmatpush.msra.mxu0 %v1148_v0  ;;  %v807_v2 = vpack.i.bf16 %v1150_v1, %v1148_v0  ;;  %v1155_v3 = vld [vmem:[#allocation5 + $0x8] sm:$0xff]  ;;  %v1157_v4 = vld [vmem:[#allocation5] sm:$0xff]  ;;  %v267_v8 = vld [vmem:[#allocation7 + $0x30] sm:$0xff]  ;;  %s1005_s23 = smov 64   ;;  %s1006_s29 = smov 96   ;;  %vm376_vm1 = vcmask 392448  }
  0x32   : > { %v812_v5 = vpack.i.bf16 %v1157_v4, %v1155_v3  ;;  %v224_v6 = vld [vmem:[%s190_s5] sm:$0xff]  ;;  %v225_v7 = vld [vmem:[%s190_s5 + $0x8] sm:$0xff]  ;;  %vm363_vm2 = vcmask 261248   ;;  %vm350_vm3 = vcmask 130048   ;;  %vm389_vm4 = vcmask 523648   ;;  %s712_s30 = sshll.u32 %s1050_s16, 4 }
  0x33   : > { %251 = vmatpush.msra.mxu0 %v1150_v1  ;;  %v268_v9 = vld [vmem:[#allocation7 + $0x38] sm:$0xff]  ;;  %v265_v11 = vld [vmem:[#allocation7 + $0x20] sm:$0xff]  ;;  %v266_v12 = vld [vmem:[#allocation7 + $0x28] sm:$0xff]  ;;  %vm406_vm5 = vcmask 392192   ;;  %vm449_vm6 = vcmask 523264   ;;  %s223_s26 = scalar_lea.vmem [#allocation8], %s686_s24  ;;  %s581_s4 = scalar_lea.hbm %s1292_s3, %s712_s30 }
  0x34   : > { %v787_v10 = vpack.i.bf16 %v267_v8, %v268_v9  ;;  %v792_v13 = vpack.i.bf16 %v265_v11, %v266_v12  ;;  %v264_v38 = vld [vmem:[#allocation7 + $0x18] sm:$0xff]  ;;  %v1187_v40 = vld [vmem:[#allocation7 + $0x10] sm:$0xff]  ;;  %v1190_v42 = vld [vmem:[#allocation7 + $0x8] sm:$0xff]  ;;  %s582_s7 = sshll.u32 %s223_s26, 4  ;;  %s584_s8 = sshll.u32 %s581_s4, 4  ;;  %s583_s7 = int_to_ptr.vmem [resolvable:$true] %s582_s7  ;;  %s585_s8 = int_to_ptr.hbm [resolvable:$true] %s584_s8 }
  0x35   : > { %252 = vmatpush.msra.mxu0 %v1155_v3  ;;  %v1195_v44 = vld [vmem:[#allocation7] sm:$0xff]  ;;  %v797_v54 = vpack.i.bf16 %v1187_v40, %v264_v38  ;;  %s570_s17 = scalar_lea.sflag [#allocation4], %s1134_s11  ;;  %s942_s16 = sshra.s32 %s585_s8, 4  ;;  %s943_s16 = int_to_ptr.hbm [resolvable:$true] %s942_s16 }
  0x36   : > { %788 = vrot.lane.b32.xlu2 %v787_v10, %s1004_s18  ;;  %v802_v56 = vpack.i.bf16 %v1195_v44, %v1190_v42  ;;  %s944_s20 = scalar_lea.hbm %s943_s16, 16  ;;  %s948_s24 = scalar_lea.hbm %s1292_s3, 32 }
  0x37   : > { %253 = vmatpush.msra.mxu0 %v1157_v4  ;;  %p945_p1 = scmp.ne.s32.totalorder %s943_s16, %s944_s20  ;;  %p949_p11 = scmp.lt.s32.totalorder %s943_s16, %s1292_s3 }
  0x38   : > { %690 = vmatmul.msk.f32.vlgmr.msra.gmra.mxu0 %vm231_vm0, %v224_v6  ;;  %p950_p2 = scmp.lt.s32.totalorder %s948_s24, %s944_s20 }
  0x39   : > { %p946_p4 = pnand %p945_p1, %p1101_p3 }
  0x3a   : > { %p951_p9 = por %p950_p2, %p949_p11 }
  0x3b   : > { %p947_p8 = pneg %p946_p4 }
  0x3d   : > { %p952_p10 = pnand %p951_p9, %p947_p8 }
  0x3e   : > { %793 = vrot.lane.b32.xlu2 %v792_v13, %s1004_s18 }
  0x40   : > { %691 = vmatmul.msk.f32.gmra.mxu0 %vm231_vm0, %v225_v7 }
  0x90   : > { %v789_v16 = vpop.permute.xlu2 %788 }
  0x91   : > { %v790_v18 = vunpack.i.l.bf16 %v789_v16  ;;  %v791_v21 = vunpack.i.h.bf16 %v789_v16 }
  0x98   : > { %v794_v25 = vpop.permute.xlu2 %793 }
  0x99   : > { %v795_v26 = vunpack.i.l.bf16 %v794_v25  ;;  %v796_v29 = vunpack.i.h.bf16 %v794_v25 }
  0xb5   : > { %v255_v14 = vpop.f32.mrf.mxu0 }
  0xb6   : > { %285 = vrot.lane.b32.xlu1 %v255_v14, %s1005_s23 }
  0xbd   : > { %v258_v15 = vpop.f32.mrf.mxu0 }
  0xbe   : > { %287 = vrot.lane.b32.xlu1 %v258_v15, %s1005_s23  ;;  %273 = vrot.lane.b32.xlu0 %v258_v15, %s1006_s29 }
  0xc6   : > { %271 = vrot.lane.b32.xlu0 %v255_v14, %s1006_s29 }
 0x128   : > { %v1170_v17 = vpop.permute.xlu1 %285 }
 0x129   : > { %v297_v24 = vmul.f32 %v1170_v17, %v267_v8  ;;  %v295_v31 = vmul.f32 %v1170_v17, %v265_v11 }
 0x12b   : > { %v447_v30 = vsel %vm231_vm0, %v297_v24, %v791_v21  ;;  %v445_v34 = vsel %vm231_vm0, %v295_v31, %v796_v29 }
 0x130   : > { %v1172_v19 = vpop.permute.xlu1 %287  ;;  %v274_v20 = vpop.permute.xlu0 %273 }
 0x131   : > { %v284_v22 = vmul.f32 %v274_v20, %v268_v9  ;;  %v298_v23 = vmul.f32 %v1172_v19, %v268_v9  ;;  %v296_v28 = vmul.f32 %v1172_v19, %v266_v12  ;;  %v282_v36 = vmul.f32 %v274_v20, %v266_v12 }
 0x132   : > { %v280_v39 = vmul.f32 %v274_v20, %v264_v38  ;;  %v278_v43 = vmul.f32 %v274_v20, %v1190_v42  ;;  %v294_v13 = vmul.f32 %v1172_v19, %v264_v38  ;;  %v293_v20 = vmul.f32 %v1170_v17, %v1187_v40 }
 0x133   : > { %692 = vmatpush.xpose.msk.msra.mxu1 %vm231_vm0, %v284_v22  ;;  %v448_v27 = vsel %vm231_vm0, %v298_v23, %v790_v18  ;;  %v446_v32 = vsel %vm231_vm0, %v296_v28, %v795_v26  ;;  %v292_v23 = vmul.f32 %v1172_v19, %v1190_v42  ;;  %v291_v28 = vmul.f32 %v1170_v17, %v1195_v44 }
 0x134   : > { %464 = vmatpush.msra.mxu2 %v448_v27 }
 0x136   : > { %465 = vmatpush.msra.mxu2 %v447_v30 }
 0x138   : > { %466 = vmatpush.msra.mxu2 %v446_v32  ;;  %v272_v33 = vpop.permute.xlu0 %271 }
 0x139   : > { %v283_v35 = vmul.f32 %v272_v33, %v267_v8  ;;  %v281_v37 = vmul.f32 %v272_v33, %v265_v11  ;;  %v279_v41 = vmul.f32 %v272_v33, %v1187_v40  ;;  %v277_v45 = vmul.f32 %v272_v33, %v1195_v44 }
 0x13a   : > { %467 = vmatpush.msra.mxu2 %v445_v34 }
 0x13b   : > { %693 = vmatpush.xpose.msk.msra.mxu1 %vm231_vm0, %v283_v35 }
 0x13f   : > { %694 = vmatpush.xpose.msk.msra.mxu1 %vm231_vm0, %v282_v36 }
 0x143   : > { %695 = vmatpush.xpose.msk.msra.mxu1 %vm231_vm0, %v281_v37 }
 0x147   : > { %696 = vmatpush.xpose.msk.msra.mxu1 %vm231_vm0, %v280_v39 }
 0x14b   : > { %697 = vmatpush.xpose.msk.msra.mxu1 %vm231_vm0, %v279_v41 }
 0x14f   : > { %698 = vmatpush.xpose.msk.msra.mxu1 %vm231_vm0, %v278_v43 }
 0x153   : > { %699 = vmatpush.xpose.msk.msra.mxu1 %vm231_vm0, %v277_v45 }
 0x156   : > { %700 = vmatmul.msk.f32.vlgmr.msra.gmra.mxu1 %vm231_vm0, %v255_v14 }
 0x15e   : > { %701 = vmatmul.msk.f32.gmra.mxu1 %vm231_vm0, %v258_v15 }
 0x1d3   : > { %v344_v46 = vpop.f32.mrf.mxu1 }
 0x1d4   : > { %v377_v47 = vsel %vm376_vm1, %v344_v46, -inf  ;;  %v364_v48 = vsel %vm363_vm2, %v344_v46, -inf  ;;  %v351_v49 = vsel %vm350_vm3, %v344_v46, -inf  ;;  %v390_v52 = vsel %vm389_vm4, %v344_v46, -inf }
 0x1d5   : > { %378 = vmax.xlane.f32.xlu1 %v377_v47  ;;  %365 = vmax.xlane.f32.xlu0 %v364_v48 }
 0x1d6   : > { %352 = vmax.xlane.f32.xlu2 %v351_v49 }
 0x1db   : > { %v1203_v50 = vpop.f32.mrf.mxu1 }
 0x1dc   : > { %v354_v51 = vsel %vm350_vm3, %v1203_v50, -inf  ;;  %v367_v53 = vsel %vm363_vm2, %v1203_v50, -inf  ;;  %v380_v55 = vsel %vm376_vm1, %v1203_v50, -inf  ;;  %v393_v57 = vsel %vm389_vm4, %v1203_v50, -inf }
 0x1dd   : > { %355 = vmax.xlane.f32.xlu1 %v354_v51 }
 0x1de   : > { %391 = vmax.xlane.f32.xlu2 %v390_v52 }
 0x1e5   : > { %368 = vmax.xlane.f32.xlu1 %v367_v53 }
 0x1e9   : > { %798 = vrot.lane.b32.xlu0 %v797_v54, %s1004_s18 }
 0x1ed   : > { %381 = vmax.xlane.f32.xlu1 %v380_v55 }
 0x1f6   : > { %803 = vrot.lane.b32.xlu2 %v802_v56, %s1004_s18 }
 0x1fe   : > { %808 = vrot.lane.b32.xlu2 %v807_v2, %s1004_s18 }
 0x213   : > { %394 = vmax.xlane.f32.xlu0 %v393_v57  ;;  %v817_v57 = vld [vmem:[#allocation5 + $0x20] ss:$0 sm:$0xff] }
 0x248   : > { %v366_v59 = vpop.xlane.xlu0 %365  ;;  %v379_v61 = vpop.xlane.xlu1 %378 }
 0x249   : > { %v353_v58 = vpop.xlane.xlu2 %352  ;;  %v370_v60 = vsub.f32 %v344_v46, %v366_v59  ;;  %v383_v6 = vsub.f32 %v344_v46, %v379_v61 }
 0x24a   : > { %v357_v62 = vsub.f32 %v344_v46, %v353_v58 }
 0x24b   : > { %v372_v7 = vmul.f32 1.442695, %v370_v60  ;;  %v385_v10 = vmul.f32 1.442695, %v383_v6 }
 0x24c   : > { %v359_v8 = vmul.f32 1.442695, %v357_v62 }
 0x24d   : > { %818 = vpow2.f32 %v372_v7 }
 0x24e   : > { %820 = vpow2.f32 %v359_v8 }
 0x24f   : > { %822 = vpow2.f32 %v385_v10 }
 0x250   : > { %v356_v31 = vpop.xlane.xlu1 %355 }
 0x251   : > { %v392_v63 = vpop.xlane.xlu2 %391  ;;  %v358_v17 = vsub.f32 %v1203_v50, %v356_v31 }
 0x252   : > { %v396_v9 = vsub.f32 %v344_v46, %v392_v63 }
 0x253   : > { %v819_v14 = vpop.eup %818  ;;  %v361_v38 = vmul.f32 1.442695, %v358_v17 }
 0x254   : > { %v398_v11 = vmul.f32 1.442695, %v396_v9  ;;  %v821_v15 = vpop.eup %820 }
 0x255   : > { %v823_v24 = vpop.eup %822  ;;  %v402_v25 = vsel %vm350_vm3, %v821_v15, %v819_v14 }
 0x256   : > { %824 = vpow2.f32 %v398_v11  ;;  %v404_v30 = vsel %vm231_vm0, %v402_v25, %v823_v24 }
 0x258   : > { %v369_v32 = vpop.xlane.xlu1 %368 }
 0x259   : > { %v804_v0 = vpop.permute.xlu2 %803  ;;  %v371_v34 = vsub.f32 %v1203_v50, %v369_v32 }
 0x25a   : > { %v805_v16 = vunpack.i.l.bf16 %v804_v0  ;;  %v806_v21 = vunpack.i.h.bf16 %v804_v0 }
 0x25b   : > { %v799_v1 = vpop.permute.xlu0 %798  ;;  %v374_v36 = vmul.f32 1.442695, %v371_v34 }
 0x25c   : > { %v801_v2 = vunpack.i.h.bf16 %v799_v1  ;;  %v800_v12 = vunpack.i.l.bf16 %v799_v1  ;;  %v825_v26 = vpop.eup %824  ;;  %v442_v27 = vsel %vm231_vm0, %v292_v23, %v805_v16  ;;  %v441_v29 = vsel %vm231_vm0, %v291_v28, %v806_v21 }
 0x25d   : > { %v407_v19 = vsel %vm406_vm5, %v404_v30, %v825_v26  ;;  %826 = vpow2.f32 %v374_v36 }
 0x25e   : > { %v444_v18 = vsel %vm231_vm0, %v294_v13, %v800_v12  ;;  %v443_v22 = vsel %vm231_vm0, %v293_v20, %v801_v2 }
 0x25f   : > { %468 = vmatpush.msra.mxu2 %v444_v18 }
 0x260   : > { %v382_v33 = vpop.xlane.xlu1 %381 }
 0x261   : > { %469 = vmatpush.msra.mxu2 %v443_v22  ;;  %v384_v35 = vsub.f32 %v1203_v50, %v382_v33  ;;  %v809_v51 = vpop.permute.xlu2 %808 }
 0x262   : > { %v810_v52 = vunpack.i.l.bf16 %v809_v51  ;;  %v811_v53 = vunpack.i.h.bf16 %v809_v51 }
 0x263   : > { %470 = vmatpush.msra.mxu2 %v442_v27  ;;  %v387_v37 = vmul.f32 1.442695, %v384_v35  ;;  %v827_v42 = vpop.eup %826 }
 0x264   : > { %556 = vmatpush.msra.mxu3 %v810_v52 }
 0x265   : > { %471 = vmatpush.msra.mxu2 %v441_v29  ;;  %828 = vpow2.f32 %v387_v37 }
 0x266   : > { %702 = vmatmul.msk.f32.vlgmr.msra.gmra.mxu2 %vm449_vm6, %v407_v19  ;;  %830 = vpow2.f32 %v361_v38  ;;  %557 = vmatpush.msra.mxu3 %v811_v53 }
 0x26b   : > { %v829_v43 = vpop.eup %828 }
 0x26c   : > { %v831_v44 = vpop.eup %830 }
 0x26d   : > { %v403_v45 = vsel %vm350_vm3, %v831_v44, %v827_v42 }
 0x26e   : > { %v405_v47 = vsel %vm231_vm0, %v403_v45, %v829_v43 }
 0x286   : > { %v395_v39 = vpop.xlane.xlu0 %394 }
 0x287   : > { %v397_v40 = vsub.f32 %v1203_v50, %v395_v39 }
 0x289   : > { %v400_v41 = vmul.f32 1.442695, %v397_v40 }
 0x28b   : > { %832 = vpow2.f32 %v400_v41 }
 0x291   : > { %v833_v46 = vpop.eup %832 }
 0x292   : > { %v408_v48 = vsel %vm406_vm5, %v405_v47, %v833_v46 }
 0x293   : > { %703 = vmatmul.msk.f32.gmra.mxu2 %vm449_vm6, %v408_v48 }
 0x2e9   : > { %v473_v49 = vpop.f32.mrf.mxu2 }
 0x2ea   : > { %481 = vrot.lane.b32.xlu1 %v473_v49, %s1006_s29 }
 0x2f2   : > { %535 = vrot.lane.b32.xlu1 %v817_v57, %s1004_s18 }
 0x316   : > { %v476_v50 = vpop.f32.mrf.mxu2 }
 0x317   : > { %483 = vrot.lane.b32.xlu2 %v476_v50, %s1006_s29 }
 0x31f   : > { %813 = vrot.lane.b32.xlu2 %v812_v5, %s1004_s18 }
 0x35c   : > { %v482_v54 = vpop.permute.xlu1 %481 }
 0x35d   : > { %834 = vrcp.f32 %v482_v54  ;;  %v498_v3 = vand.u32 2147483648, %v482_v54  ;;  %vm492_vm8 = vweird.f32 %v482_v54  ;;  %v496_v4 = vand.u32 2147483647, %v482_v54 }
 0x35f   : > { %v499_v63 = vor.u32 1.1754944e-38, %v498_v3  ;;  %vm497_vm10 = vcmp.eq.f32.partialorder %v496_v4, 8.507059e+37 }
 0x363   : > { %v835_v55 = vpop.eup %834 }
 0x364   : > { %v488_v56 = vmul.f32 %v835_v55, %v482_v54  ;;  %vm493_vm7 = vweird.f32 %v835_v55  ;;  %v536_v20 = vpop.permute.xlu1 %535 }
 0x365   : > { %vm494_vm9 = vmor %vm492_vm8, %vm493_vm7 }
 0x366   : > { %v489_v58 = vsub.f32 1.0, %v488_v56 }
 0x368   : > { %v490_v59 = vmul.f32 %v835_v55, %v489_v58 }
 0x36a   : > { %v491_v61 = vadd.f32 %v835_v55, %v490_v59 }
 0x36c   : > { %v495_v5 = vsel %vm494_vm9, %v835_v55, %v491_v61 }
 0x36d   : > { %v500_v9 = vsel %vm497_vm10, %v499_v63, %v495_v5 }
 0x36e   : > { %v501_v2 = vmul.f32 %v500_v9, %v473_v49 }
 0x371   : > { %v484_v60 = vpop.permute.xlu2 %483 }
 0x372   : > { %836 = vrcp.f32 %v484_v60  ;;  %v513_v11 = vand.u32 2147483648, %v484_v60  ;;  %v511_v12 = vand.u32 2147483647, %v484_v60  ;;  %vm507_vm12 = vweird.f32 %v484_v60 }
 0x374   : > { %v514_v14 = vor.u32 1.1754944e-38, %v513_v11  ;;  %vm512_vm14 = vcmp.eq.f32.partialorder %v511_v12, 8.507059e+37 }
 0x378   : > { %v837_v62 = vpop.eup %836 }
 0x379   : > { %v503_v6 = vmul.f32 %v837_v62, %v484_v60  ;;  %v814_v7 = vpop.permute.xlu2 %813  ;;  %vm508_vm11 = vweird.f32 %v837_v62 }
 0x37a   : > { %v815_v8 = vunpack.i.l.bf16 %v814_v7  ;;  %v816_v0 = vunpack.i.h.bf16 %v814_v7  ;;  %vm509_vm13 = vmor %vm507_vm12, %vm508_vm11 }
 0x37b   : > { %v504_v10 = vsub.f32 1.0, %v503_v6 }
 0x37c   : > { %558 = vmatpush.msra.mxu3 %v815_v8 }
 0x37d   : > { %v505_v1 = vmul.f32 %v837_v62, %v504_v10 }
 0x37e   : > { %559 = vmatpush.msra.mxu3 %v816_v0 }
 0x37f   : > { %704 = vmatmul.msk.f32.vlgmr.msra.gmra.mxu3 %vm231_vm0, %v501_v2  ;;  %v506_v13 = vadd.f32 %v837_v62, %v505_v1 }
 0x381   : > { %v510_v15 = vsel %vm509_vm13, %v837_v62, %v506_v13 }
 0x382   : > { %v515_v16 = vsel %vm512_vm14, %v514_v14, %v510_v15 }
 0x383   : > { %v516_v18 = vmul.f32 %v515_v16, %v476_v50 }
 0x387   : > { %705 = vmatmul.msk.f32.gmra.mxu3 %vm231_vm0, %v516_v18 }
 0x402   : > { %v561_v21 = vpop.f32.mrf.mxu3 }
 0x403   : > { %v562_v22 = vadd.f32 %v561_v21, %v536_v20 }
 0x405   : > { %567 = vst.msk [vmem:[%s223_s26] sm:$0xff] %vm231_vm0, %v562_v22 }
 0x40a   : > { %v564_v23 = vpop.f32.mrf.mxu3 }
 0x40b   : > { %v565_v24 = vadd.f32 %v564_v23, %v536_v20 }
 0x40d   : > { %568 = vst.msk [vmem:[%s223_s26 + $0x8] sm:$0xff] %vm231_vm0, %v565_v24 }
 0x40e   : > { %955 = shalt.err (!%p952_p10)
}
 0x40f   : > { %s1007_s11 = smov 128   ;;  %s1008_s18 = smov 8  }
 0x410   : > { %723 = dma.vmem_to_hbm [thread:$0]  (%p1101_p3), %s583_s7, 256, %s585_s8, %s570_s17, %s1007_s11, %s1007_s11, %s1008_s18  }
 0x411 PF: > { %s599_s23 = sand.u32 1, %s986_s12   ;;  %p1298_p12 = scmp.ge.s32.totalorder %s998_s15, 2 }
 0x412   : > { %s600_s29 = scalar_lea.sflag [#allocation4], %s599_s23 }
 0x413   : > { %p737_p13 = pnand %p1298_p12, %p1064_p6 }
 0x415   : > { %p738_p0 = pneg %p737_p13 }
 0x417   : > { %981 = dma.done.wait (%p738_p0), %s600_s29, 256  }
 0x418   : > { %983 = vsyncadd (%p738_p0), %s600_s29, 4294967040  ;;  %p17_p5 = scmp.ge.s32.totalorder %s1091_s6, 4   ;;  %s1299_s12 = smov %s990_s13 }
 0x419   : > { %s1300_s13 = smov %s994_s14  ;;  %s1301_s14 = smov %s1107_s10 }
 0x41a   : > { %s1302_s15 = smov %s1091_s6  ;;  %19 = sbr.rel (!%p17_p5) target bundleno = 6 (0x6), region = 85 }
 0x41f   :  { %606 = vsyncpa [#allocation3], 1 }
 0x420   :  { %608 = vsyncpa [#allocation3 + $0x1], 1 }
 0x421   :  { %609 = vsyncpa [#allocation6], 1 }
 0x422   :  { %610 = vsyncpa [#allocation4], 1 }
 0x423   :  { %612 = vsyncpa [#allocation4 + $0x1], 1 }

</bundles_post_ra>
